<compile_context>
chip_gen: v7x
topology: tpu7x:2x2x1
jax: 0.10.0
libtpu: 0.0.40
codegen_flags: <defaults>
</compile_context>

<pallas_src>
import functools

import jax
import jax.numpy as jnp
from jax.experimental import pallas as pl
from jax.experimental.pallas import tpu as pltpu


# --------------------------------------------------------------------------- #
# Kernel
# --------------------------------------------------------------------------- #
def attention_kernel(inp_ref, src_ref, w_in_ref, w_out_src_ref, w_out_in_ref,
                     *out_refs, approx_recip, with_attn):
    if with_attn:
        out_ref, attn_ref = out_refs
    else:
        (out_ref,) = out_refs

    bB, S, D_src = src_ref.shape
    rows, D_in = inp_ref.shape          # rows == bB * T (batch folded into M)
    T = rows // bB
    md = src_ref.dtype                  # compute dtype chosen at the boundary

    inp2 = inp_ref[...]                 # (bB*T, D_in), already compute dtype
    src = src_ref[...]                  # (bB, S, D_src), already compute dtype

    # x = input_proj(input): batch folded into the MXU M dimension, f32 acc.
    x = jnp.dot(inp2, w_in_ref[...], preferred_element_type=jnp.float32)
    x3 = x.reshape(bB, T, D_src).astype(md)          # (bB, T, D_src)

    # attn logits: contract last dims of both operands (transposed-RHS matmul,
    # no vxpose / relayout of source_hids).
    logits = jnp.einsum("btd,bsd->bts", x3, src,
                        preferred_element_type=jnp.float32)      # (bB, T, S)
    # TODO(synk): optional `mask` (masked_fill with -inf before softmax) not
    # implemented; this forward corresponds to mask=None.

    # Softmax over the source dimension, kept in f32 (exp on EUP).
    m = jnp.max(logits, axis=-1, keepdims=True)
    e = jnp.exp(logits - m)
    denom = jnp.sum(e, axis=-1, keepdims=True)
    if approx_recip:
        attn = e * pl.reciprocal(denom, approx=True)             # EUP vrcp slot
    else:
        attn = e / denom

    if with_attn:
        attn_ref[...] = attn.reshape(rows, S).astype(attn_ref.dtype)

    # mix = bmm(attn, source_hids)
    mix = jnp.einsum("bts,bsd->btd", attn.astype(md), src,
                     preferred_element_type=jnp.float32)         # (bB, T, D_src)

    # output = tanh(output_proj(cat(mix, input)))  ==  tanh(mix@W_src + inp@W_in)
    acc = jnp.dot(mix.reshape(rows, D_src).astype(md), w_out_src_ref[...],
                  preferred_element_type=jnp.float32)            # (bB*T, D_out)
    acc = acc + jnp.dot(inp2, w_out_in_ref[...],
                        preferred_element_type=jnp.float32)
    out_ref[...] = jnp.tanh(acc).astype(out_ref.dtype)


# --------------------------------------------------------------------------- #
# Block sizing (VMEM-budget aware, generation aware)
# --------------------------------------------------------------------------- #
def _vmem_budget_bytes():
    """~3/4 of this generation's per-core VMEM (v5e/v6e 128 MiB, v7x 64 MiB)."""
    try:
        cap = int(pltpu.get_tpu_info().vmem_capacity_bytes)
    except Exception:
        cap = 64 << 20  # conservative fallback (v7x-sized VMEM)
    return (cap * 3) // 4


def _step_vmem_bytes(bB, T, S, D_in, D_src, D_out, in_elt, out_elt,
                     return_attn, weight_bufs):
    rows = bB * T
    act_in = rows * D_in * in_elt + bB * S * D_src * in_elt
    act_out = rows * D_out * out_elt + (rows * S * out_elt if return_attn else 0)
    weights = (D_in * D_src + D_src * D_out + D_in * D_out) * in_elt
    # f32 intermediates (x, logits, attn, mix, acc) held in VMEM/vregs.
    interm = rows * (2 * D_src + 2 * S + D_out) * 4
    return 2 * (act_in + act_out) + weight_bufs * weights + interm


def _pick_block_b(B, T, S, D_in, D_src, D_out, in_elt, out_elt,
                  return_attn, weight_bufs, budget, prefer_multicore=True):
    """Largest divisor bB of B whose per-step footprint fits the VMEM budget.
    Prefers grid_b = B // bB >= 2 so a v7x megacore can shard the batch axis
    (no cost on single-TC chips beyond one extra ~0.35us grid step)."""
    divisors = [d for d in range(1, B + 1) if B % d == 0]
    fits = [d for d in divisors
            if _step_vmem_bytes(d, T, S, D_in, D_src, D_out, in_elt, out_elt,
                                return_attn, weight_bufs) <= budget]
    if not fits:
        return 1
    if prefer_multicore:
        multi = [d for d in fits if B // d >= 2]
        if multi:
            return max(multi)
    return max(fits)


def _weight_spec(shape, single_buffer):
    """Constant-index weight block.  The block never changes across the grid, so
    single-buffer it when the JAX build supports pipeline_mode=pl.Buffered(1)."""
    if single_buffer:
        try:
            return pl.BlockSpec(shape, lambda b: (0, 0),
                                pipeline_mode=pl.Buffered(1))
        except (TypeError, AttributeError):
            pass
    return pl.BlockSpec(shape, lambda b: (0, 0))


# --------------------------------------------------------------------------- #
# Wrapper
# --------------------------------------------------------------------------- #
def attention_forward(inp, source_hids, w_in_t, w_out_t, *, block_b=None,
                      compute_dtype=jnp.bfloat16, out_dtype=None,
                      approx_recip=True, return_attn=True,
                      single_buffer_weights=True):
    B, T, D_in = inp.shape
    Bs, S, D_src = source_hids.shape
    assert Bs == B
    assert w_in_t.shape == (D_in, D_src)
    assert w_out_t.shape[0] == D_src + D_in
    D_out = w_out_t.shape[1]
    if out_dtype is None:
        out_dtype = compute_dtype

    # Pad T to a sublane multiple so in-kernel reshapes are layout no-ops.
    T_pad = ((T + 7) // 8) * 8
    if T_pad != T:
        inp = jnp.pad(inp, ((0, 0), (0, T_pad - T), (0, 0)))

    # Cast at the boundary: halves HBM traffic for the dominant reads (fast path).
    inp_c = inp.astype(compute_dtype)
    src_c = source_hids.astype(compute_dtype)
    w_in_c = w_in_t.astype(compute_dtype)
    # Split the output projection so the kernel never concatenates along lanes.
    w_out_src_c = w_out_t[:D_src].astype(compute_dtype)   # multiplies mix
    w_out_in_c = w_out_t[D_src:].astype(compute_dtype)    # multiplies input

    in_elt = jnp.dtype(compute_dtype).itemsize
    out_elt = jnp.dtype(out_dtype).itemsize
    weight_bufs = 1 if single_buffer_weights else 2

    budget = _vmem_budget_bytes()
    if block_b is None:
        block_b = _pick_block_b(B, T_pad, S, D_in, D_src, D_out, in_elt, out_elt,
                                return_attn, weight_bufs, budget)
    assert B % block_b == 0
    grid_b = B // block_b
    rows = block_b * T_pad

    needed = _step_vmem_bytes(block_b, T_pad, S, D_in, D_src, D_out, in_elt,
                              out_elt, return_attn, weight_bufs)
    vmem_limit = int(min(budget, max(needed * 5 // 4, 32 << 20)))

    # Fold batch into M outside the kernel (pure layout plumbing).
    inp2 = inp_c.reshape(B * T_pad, D_in)

    kernel = functools.partial(attention_kernel,
                               approx_recip=approx_recip,
                               with_attn=return_attn)

    out_block = pl.BlockSpec((rows, D_out), lambda b: (b, 0))
    if return_attn:
        out_shape = (jax.ShapeDtypeStruct((B * T_pad, D_out), out_dtype),
                     jax.ShapeDtypeStruct((B * T_pad, S), out_dtype))
        out_specs = (out_block, pl.BlockSpec((rows, S), lambda b: (b, 0)))
    else:
        out_shape = jax.ShapeDtypeStruct((B * T_pad, D_out), out_dtype)
        out_specs = out_block

    def run(single_buf):
        call = pl.pallas_call(
            kernel,
            out_shape=out_shape,
            grid_spec=pltpu.PrefetchScalarGridSpec(
                num_scalar_prefetch=0,
                grid=(grid_b,),
                in_specs=[
                    pl.BlockSpec((rows, D_in), lambda b: (b, 0)),
                    pl.BlockSpec((block_b, S, D_src), lambda b: (b, 0, 0)),
                    _weight_spec((D_in, D_src), single_buf),
                    _weight_spec((D_src, D_out), single_buf),
                    _weight_spec((D_in, D_out), single_buf),
                ],
                out_specs=out_specs,
            ),
            compiler_params=pltpu.CompilerParams(
                dimension_semantics=("parallel",),
                vmem_limit_bytes=vmem_limit),
        )
        return call(inp2, src_c, w_in_c, w_out_src_c, w_out_in_c)

    try:
        results = run(single_buffer_weights)
    except Exception:
        if not single_buffer_weights:
            raise
        # Fallback: if single-buffering constant weight blocks is rejected by
        # this JAX build, rerun with default double-buffering (correctness first).
        results = run(False)

    if return_attn:
        out2, attn2 = results
        return (out2.reshape(B, T_pad, D_out)[:, :T, :],
                attn2.reshape(B, T_pad, S)[:, :T, :])
    return results.reshape(B, T_pad, D_out)[:, :T, :]


# --------------------------------------------------------------------------- #
# Pure-JAX reference (mirrors the PyTorch module, mask=None)
# --------------------------------------------------------------------------- #
def reference_forward(inp, source_hids, w_in_t, w_out_t):
    x = jnp.einsum("btd,ds->bts", inp, w_in_t)
    logits = jnp.einsum("bts,bks->btk", x, source_hids)
    attn = jax.nn.softmax(logits, axis=-1)
    mix = jnp.einsum("btk,bks->bts", attn, source_hids)
    combined = jnp.concatenate([mix, inp], axis=-1)
    out = jnp.tanh(jnp.einsum("btc,co->bto", combined, w_out_t))
    return out, attn


if __name__ == "__main__":
    # Small shapes consistent with the module.
    B, T, S = 2, 8, 8
    input_dim = 32
    source_dim = 32
    output_dim = 32

    key = jax.random.PRNGKey(0)
    k_inp, k_src, k_win, k_wout, k_inp2 = jax.random.split(key, 5)

    inp = jax.random.normal(k_inp, (B, T, input_dim), dtype=jnp.float32)
    source_hids = jax.random.normal(k_src, (B, S, source_dim), dtype=jnp.float32)

    # Deterministic parameter init mirroring nn.Linear (uniform +/- 1/sqrt(fan_in)),
    # stored transposed for row-major matmul inside the kernel (bias=False).
    bound_in = 1.0 / (input_dim ** 0.5)
    w_in_t = jax.random.uniform(
        k_win, (input_dim, source_dim), dtype=jnp.float32,
        minval=-bound_in, maxval=bound_in)
    bound_out = 1.0 / ((input_dim + source_dim) ** 0.5)
    w_out_t = jax.random.uniform(
        k_wout, (source_dim + input_dim, output_dim), dtype=jnp.float32,
        minval=-bound_out, maxval=bound_out)

    ref_out, ref_attn = reference_forward(inp, source_hids, w_in_t, w_out_t)

    # Precise path (f32 boundary dtypes, exact softmax division) — tight check.
    out, attn = attention_forward(inp, source_hids, w_in_t, w_out_t,
                                  compute_dtype=jnp.float32,
                                  out_dtype=jnp.float32,
                                  approx_recip=False)
    jax.block_until_ready((out, attn))
    assert out.shape == (B, T, output_dim) and attn.shape == (B, T, S)
    assert jnp.allclose(out, ref_out, atol=1e-5, rtol=1e-5)
    assert jnp.allclose(attn, ref_attn, atol=1e-5, rtol=1e-5)

    # Fast path (defaults): bf16 boundary + bf16 outputs + approx reciprocal.
    out_f, attn_f = attention_forward(inp, source_hids, w_in_t, w_out_t)
    jax.block_until_ready((out_f, attn_f))
    assert jnp.allclose(out_f.astype(jnp.float32), ref_out, atol=5e-2, rtol=5e-2)
    assert jnp.allclose(attn_f.astype(jnp.float32), ref_attn, atol=5e-2, rtol=5e-2)

    # Output-only fast path: skips the attn HBM writeback entirely.
    out_o = attention_forward(inp, source_hids, w_in_t, w_out_t,
                              return_attn=False)
    jax.block_until_ready(out_o)
    assert out_o.shape == (B, T, output_dim)
    assert jnp.allclose(out_o.astype(jnp.float32), ref_out, atol=5e-2, rtol=5e-2)

    # Ragged T (padded to a sublane multiple inside the wrapper), precise path.
    T2 = 5
    inp_r = jax.random.normal(k_inp2, (B, T2, input_dim), dtype=jnp.float32)
    ref_out2, ref_attn2 = reference_forward(inp_r, source_hids, w_in_t, w_out_t)
    out2, attn2 = attention_forward(inp_r, source_hids, w_in_t, w_out_t,
                                    compute_dtype=jnp.float32,
                                    out_dtype=jnp.float32,
                                    approx_recip=False)
    jax.block_until_ready((out2, attn2))
    assert out2.shape == (B, T2, output_dim) and attn2.shape == (B, T2, S)
    assert jnp.allclose(out2, ref_out2, atol=1e-5, rtol=1e-5)
    assert jnp.allclose(attn2, ref_attn2, atol=1e-5, rtol=1e-5)

    print("KERNEL_OK")
</pallas_src>

<mosaic_0001>
module attributes {stable_mosaic.version = 11 : i64} {
  func.func @attention_kernel(%arg0: i32, %arg1: memref<8x32xf32, #tpu.memory_space<vmem>>, %arg2: memref<1x8x32xf32, #tpu.memory_space<vmem>>, %arg3: memref<32x32xf32, #tpu.memory_space<vmem>>, %arg4: memref<32x32xf32, #tpu.memory_space<vmem>>, %arg5: memref<32x32xf32, #tpu.memory_space<vmem>>, %arg6: memref<8x32xf32, #tpu.memory_space<vmem>>, %arg7: memref<8x8xf32, #tpu.memory_space<vmem>>) attributes {dimension_semantics = [#tpu.dimension_semantics<parallel>], iteration_bounds = array<i64: 2>, scalar_prefetch = 0 : i64, scratch_operands = 0 : i64, tpu.core_type = #tpu.core_type<tc>, window_params = [{transform_indices = @transform_0, window_bounds = array<i64: 8, 32>}, {transform_indices = @transform_1, window_bounds = array<i64: 1, 8, 32>}, {pipeline_mode = #tpu.pipeline_mode<synchronous>, transform_indices = @transform_2, window_bounds = array<i64: 32, 32>}, {pipeline_mode = #tpu.pipeline_mode<synchronous>, transform_indices = @transform_3, window_bounds = array<i64: 32, 32>}, {pipeline_mode = #tpu.pipeline_mode<synchronous>, transform_indices = @transform_4, window_bounds = array<i64: 32, 32>}, {transform_indices = @transform_5, window_bounds = array<i64: 8, 32>}, {transform_indices = @transform_6, window_bounds = array<i64: 8, 8>}]} {
    %c0 = arith.constant 0 : index
    %c0_0 = arith.constant 0 : index
    %0 = vector.load %arg1[%c0, %c0_0] : memref<8x32xf32, #tpu.memory_space<vmem>>, vector<8x32xf32>
    %c0_1 = arith.constant 0 : index
    %c0_2 = arith.constant 0 : index
    %c0_3 = arith.constant 0 : index
    %1 = vector.load %arg2[%c0_1, %c0_2, %c0_3] : memref<1x8x32xf32, #tpu.memory_space<vmem>>, vector<1x8x32xf32>
    %c0_4 = arith.constant 0 : index
    %c0_5 = arith.constant 0 : index
    %2 = vector.load %arg3[%c0_4, %c0_5] : memref<32x32xf32, #tpu.memory_space<vmem>>, vector<32x32xf32>
    %cst = arith.constant dense<0.000000e+00> : vector<8x32xf32>
    %3 = tpu.matmul %0, %2, %cst {dimension_numbers = #tpu.dot_dimension_numbers<[1], [0], [0], [1], [0, 0, 1, 1], [], []>} : vector<8x32xf32>, vector<32x32xf32>, vector<8x32xf32> -> vector<8x32xf32>
    %4 = vector.shape_cast %3 : vector<8x32xf32> to vector<1x8x32xf32>
    "tpu.trace_start"() <{level = 10 : i32, message = "btd,bsd->bts"}> : () -> ()
    %cst_6 = arith.constant dense<0.000000e+00> : vector<1x8x8xf32>
    %5 = tpu.matmul %4, %1, %cst_6 {dimension_numbers = #tpu.dot_dimension_numbers<[2], [2], [1], [1], [0, 0, 0, 1, 1, 1], [0], [0]>} : vector<1x8x32xf32>, vector<1x8x32xf32>, vector<1x8x8xf32> -> vector<1x8x8xf32>
    "tpu.trace_stop"() : () -> ()
    %cst_7 = arith.constant dense<0xFF800000> : vector<1x8xf32>
    %6 = vector.multi_reduction <maximumf>, %5, %cst_7 [2] : vector<1x8x8xf32> to vector<1x8xf32>
    %7 = vector.shape_cast %6 : vector<1x8xf32> to vector<1x8x1xf32>
    %8 = vector.broadcast %7 : vector<1x8x1xf32> to vector<1x8x8xf32>
    %9 = arith.subf %5, %8 : vector<1x8x8xf32>
    %10 = math.exp %9 : vector<1x8x8xf32>
    %cst_8 = arith.constant dense<0.000000e+00> : vector<1x8xf32>
    %11 = vector.multi_reduction <add>, %10, %cst_8 [2] : vector<1x8x8xf32> to vector<1x8xf32>
    %12 = vector.shape_cast %11 : vector<1x8xf32> to vector<1x8x1xf32>
    %13 = vector.broadcast %12 : vector<1x8x1xf32> to vector<1x8x8xf32>
    %14 = arith.divf %10, %13 : vector<1x8x8xf32>
    %15 = vector.shape_cast %14 : vector<1x8x8xf32> to vector<8x8xf32>
    %c0_9 = arith.constant 0 : index
    %c0_10 = arith.constant 0 : index
    %16 = vector.load %arg7[%c0_9, %c0_10] : memref<8x8xf32, #tpu.memory_space<vmem>>, vector<8x8xf32>
    tpu.vector_store %arg7[%c0_9, %c0_10], %15 {strides = array<i32>} : memref<8x8xf32, #tpu.memory_space<vmem>>, vector<8x8xf32>,
    "tpu.trace_start"() <{level = 10 : i32, message = "bts,bsd->btd"}> : () -> ()
    %cst_11 = arith.constant dense<0.000000e+00> : vector<1x8x32xf32>
    %17 = tpu.matmul %14, %1, %cst_11 {dimension_numbers = #tpu.dot_dimension_numbers<[2], [1], [1], [2], [0, 0, 0, 1, 1, 2], [0], [0]>} : vector<1x8x8xf32>, vector<1x8x32xf32>, vector<1x8x32xf32> -> vector<1x8x32xf32>
    "tpu.trace_stop"() : () -> ()
    %18 = vector.shape_cast %17 : vector<1x8x32xf32> to vector<8x32xf32>
    %c0_12 = arith.constant 0 : index
    %c0_13 = arith.constant 0 : index
    %19 = vector.load %arg4[%c0_12, %c0_13] : memref<32x32xf32, #tpu.memory_space<vmem>>, vector<32x32xf32>
    %cst_14 = arith.constant dense<0.000000e+00> : vector<8x32xf32>
    %20 = tpu.matmul %18, %19, %cst_14 {dimension_numbers = #tpu.dot_dimension_numbers<[1], [0], [0], [1], [0, 0, 1, 1], [], []>} : vector<8x32xf32>, vector<32x32xf32>, vector<8x32xf32> -> vector<8x32xf32>
    %c0_15 = arith.constant 0 : index
    %c0_16 = arith.constant 0 : index
    %21 = vector.load %arg5[%c0_15, %c0_16] : memref<32x32xf32, #tpu.memory_space<vmem>>, vector<32x32xf32>
    %cst_17 = arith.constant dense<0.000000e+00> : vector<8x32xf32>
    %22 = tpu.matmul %0, %21, %cst_17 {dimension_numbers = #tpu.dot_dimension_numbers<[1], [0], [0], [1], [0, 0, 1, 1], [], []>} : vector<8x32xf32>, vector<32x32xf32>, vector<8x32xf32> -> vector<8x32xf32>
    %23 = arith.addf %20, %22 : vector<8x32xf32>
    %24 = math.tanh %23 : vector<8x32xf32>
    %c0_18 = arith.constant 0 : index
    %c0_19 = arith.constant 0 : index
    %25 = vector.load %arg6[%c0_18, %c0_19] : memref<8x32xf32, #tpu.memory_space<vmem>>, vector<8x32xf32>
    tpu.vector_store %arg6[%c0_18, %c0_19], %24 {strides = array<i32>} : memref<8x32xf32, #tpu.memory_space<vmem>>, vector<8x32xf32>,
    return
  }
  func.func @transform_0(%arg0: i32) -> (i32, i32) {
    %c0_i32 = arith.constant 0 : i32
    %c0_i32_0 = arith.constant 0 : i32
    return %arg0, %c0_i32 : i32, i32
  }
  func.func @transform_1(%arg0: i32) -> (i32, i32, i32) {
    %c0_i32 = arith.constant 0 : i32
    %c0_i32_0 = arith.constant 0 : i32
    %c0_i32_1 = arith.constant 0 : i32
    return %arg0, %c0_i32, %c0_i32_0 : i32, i32, i32
  }
  func.func @transform_2(%arg0: i32) -> (i32, i32) {
    %c0_i32 = arith.constant 0 : i32
    %c0_i32_0 = arith.constant 0 : i32
    %c0_i32_1 = arith.constant 0 : i32
    return %c0_i32, %c0_i32_0 : i32, i32
  }
  func.func @transform_3(%arg0: i32) -> (i32, i32) {
    %c0_i32 = arith.constant 0 : i32
    %c0_i32_0 = arith.constant 0 : i32
    %c0_i32_1 = arith.constant 0 : i32
    return %c0_i32, %c0_i32_0 : i32, i32
  }
  func.func @transform_4(%arg0: i32) -> (i32, i32) {
    %c0_i32 = arith.constant 0 : i32
    %c0_i32_0 = arith.constant 0 : i32
    %c0_i32_1 = arith.constant 0 : i32
    return %c0_i32, %c0_i32_0 : i32, i32
  }
  func.func @transform_5(%arg0: i32) -> (i32, i32) {
    %c0_i32 = arith.constant 0 : i32
    %c0_i32_0 = arith.constant 0 : i32
    return %arg0, %c0_i32 : i32, i32
  }
  func.func @transform_6(%arg0: i32) -> (i32, i32) {
    %c0_i32 = arith.constant 0 : i32
    %c0_i32_0 = arith.constant 0 : i32
    return %arg0, %c0_i32 : i32, i32
  }
}

module attributes {stable_mosaic.version = 11 : i64} {
  func.func @attention_kernel(%arg0: i32, %arg1: memref<8x32xf32, #tpu.memory_space<vmem>>, %arg2: memref<1x8x32xf32, #tpu.memory_space<vmem>>, %arg3: memref<32x32xf32, #tpu.memory_space<vmem>>, %arg4: memref<32x32xf32, #tpu.memory_space<vmem>>, %arg5: memref<32x32xf32, #tpu.memory_space<vmem>>, %arg6: memref<8x32xf32, #tpu.memory_space<vmem>>, %arg7: memref<8x8xf32, #tpu.memory_space<vmem>>) attributes {dimension_semantics = [#tpu.dimension_semantics<parallel>], iteration_bounds = array<i64: 2>, scalar_prefetch = 0 : i64, scratch_operands = 0 : i64, tpu.core_type = #tpu.core_type<tc>, window_params = [{transform_indices = @transform_0, window_bounds = array<i64: 8, 32>}, {transform_indices = @transform_1, window_bounds = array<i64: 1, 8, 32>}, {pipeline_mode = #tpu.pipeline_mode<synchronous>, transform_indices = @transform_2, window_bounds = array<i64: 32, 32>}, {pipeline_mode = #tpu.pipeline_mode<synchronous>, transform_indices = @transform_3, window_bounds = array<i64: 32, 32>}, {pipeline_mode = #tpu.pipeline_mode<synchronous>, transform_indices = @transform_4, window_bounds = array<i64: 32, 32>}, {transform_indices = @transform_5, window_bounds = array<i64: 8, 32>}, {transform_indices = @transform_6, window_bounds = array<i64: 8, 8>}]} {
    %c0 = arith.constant 0 : index
    %c0_0 = arith.constant 0 : index
    %0 = vector.load %arg1[%c0, %c0_0] : memref<8x32xf32, #tpu.memory_space<vmem>>, vector<8x32xf32>
    %c0_1 = arith.constant 0 : index
    %c0_2 = arith.constant 0 : index
    %c0_3 = arith.constant 0 : index
    %1 = vector.load %arg2[%c0_1, %c0_2, %c0_3] : memref<1x8x32xf32, #tpu.memory_space<vmem>>, vector<1x8x32xf32>
    %c0_4 = arith.constant 0 : index
    %c0_5 = arith.constant 0 : index
    %2 = vector.load %arg3[%c0_4, %c0_5] : memref<32x32xf32, #tpu.memory_space<vmem>>, vector<32x32xf32>
    %cst = arith.constant dense<0.000000e+00> : vector<8x32xf32>
    %3 = tpu.matmul %0, %2, %cst {dimension_numbers = #tpu.dot_dimension_numbers<[1], [0], [0], [1], [0, 0, 1, 1], [], []>} : vector<8x32xf32>, vector<32x32xf32>, vector<8x32xf32> -> vector<8x32xf32>
    %4 = vector.shape_cast %3 : vector<8x32xf32> to vector<1x8x32xf32>
    "tpu.trace_start"() <{level = 10 : i32, message = "btd,bsd->bts"}> : () -> ()
    %cst_6 = arith.constant dense<0.000000e+00> : vector<1x8x8xf32>
    %5 = tpu.matmul %4, %1, %cst_6 {dimension_numbers = #tpu.dot_dimension_numbers<[2], [2], [1], [1], [0, 0, 0, 1, 1, 1], [0], [0]>} : vector<1x8x32xf32>, vector<1x8x32xf32>, vector<1x8x8xf32> -> vector<1x8x8xf32>
    "tpu.trace_stop"() : () -> ()
    %cst_7 = arith.constant dense<0xFF800000> : vector<1x8xf32>
    %6 = vector.multi_reduction <maximumf>, %5, %cst_7 [2] : vector<1x8x8xf32> to vector<1x8xf32>
    %7 = vector.shape_cast %6 : vector<1x8xf32> to vector<1x8x1xf32>
    %8 = vector.broadcast %7 : vector<1x8x1xf32> to vector<1x8x8xf32>
    %9 = arith.subf %5, %8 : vector<1x8x8xf32>
    %10 = math.exp %9 : vector<1x8x8xf32>
    %cst_8 = arith.constant dense<0.000000e+00> : vector<1x8xf32>
    %11 = vector.multi_reduction <add>, %10, %cst_8 [2] : vector<1x8x8xf32> to vector<1x8xf32>
    %12 = vector.shape_cast %11 : vector<1x8xf32> to vector<1x8x1xf32>
    %13 = vector.broadcast %12 : vector<1x8x1xf32> to vector<1x8x8xf32>
    %14 = arith.divf %10, %13 : vector<1x8x8xf32>
    %15 = vector.shape_cast %14 : vector<1x8x8xf32> to vector<8x8xf32>
    %c0_9 = arith.constant 0 : index
    %c0_10 = arith.constant 0 : index
    %16 = vector.load %arg7[%c0_9, %c0_10] : memref<8x8xf32, #tpu.memory_space<vmem>>, vector<8x8xf32>
    tpu.vector_store %arg7[%c0_9, %c0_10], %15 {strides = array<i32>} : memref<8x8xf32, #tpu.memory_space<vmem>>, vector<8x8xf32>,
    "tpu.trace_start"() <{level = 10 : i32, message = "bts,bsd->btd"}> : () -> ()
    %cst_11 = arith.constant dense<0.000000e+00> : vector<1x8x32xf32>
    %17 = tpu.matmul %14, %1, %cst_11 {dimension_numbers = #tpu.dot_dimension_numbers<[2], [1], [1], [2], [0, 0, 0, 1, 1, 2], [0], [0]>} : vector<1x8x8xf32>, vector<1x8x32xf32>, vector<1x8x32xf32> -> vector<1x8x32xf32>
    "tpu.trace_stop"() : () -> ()
    %18 = vector.shape_cast %17 : vector<1x8x32xf32> to vector<8x32xf32>
    %c0_12 = arith.constant 0 : index
    %c0_13 = arith.constant 0 : index
    %19 = vector.load %arg4[%c0_12, %c0_13] : memref<32x32xf32, #tpu.memory_space<vmem>>, vector<32x32xf32>
    %cst_14 = arith.constant dense<0.000000e+00> : vector<8x32xf32>
    %20 = tpu.matmul %18, %19, %cst_14 {dimension_numbers = #tpu.dot_dimension_numbers<[1], [0], [0], [1], [0, 0, 1, 1], [], []>} : vector<8x32xf32>, vector<32x32xf32>, vector<8x32xf32> -> vector<8x32xf32>
    %c0_15 = arith.constant 0 : index
    %c0_16 = arith.constant 0 : index
    %21 = vector.load %arg5[%c0_15, %c0_16] : memref<32x32xf32, #tpu.memory_space<vmem>>, vector<32x32xf32>
    %cst_17 = arith.constant dense<0.000000e+00> : vector<8x32xf32>
    %22 = tpu.matmul %0, %21, %cst_17 {dimension_numbers = #tpu.dot_dimension_numbers<[1], [0], [0], [1], [0, 0, 1, 1], [], []>} : vector<8x32xf32>, vector<32x32xf32>, vector<8x32xf32> -> vector<8x32xf32>
    %23 = arith.addf %20, %22 : vector<8x32xf32>
    %24 = math.tanh %23 : vector<8x32xf32>
    %c0_18 = arith.constant 0 : index
    %c0_19 = arith.constant 0 : index
    %25 = vector.load %arg6[%c0_18, %c0_19] : memref<8x32xf32, #tpu.memory_space<vmem>>, vector<8x32xf32>
    tpu.vector_store %arg6[%c0_18, %c0_19], %24 {strides = array<i32>} : memref<8x32xf32, #tpu.memory_space<vmem>>, vector<8x32xf32>,
    return
  }
  func.func @transform_0(%arg0: i32) -> (i32, i32) {
    %c0_i32 = arith.constant 0 : i32
    %c0_i32_0 = arith.constant 0 : i32
    return %arg0, %c0_i32 : i32, i32
  }
  func.func @transform_1(%arg0: i32) -> (i32, i32, i32) {
    %c0_i32 = arith.constant 0 : i32
    %c0_i32_0 = arith.constant 0 : i32
    %c0_i32_1 = arith.constant 0 : i32
    return %arg0, %c0_i32, %c0_i32_0 : i32, i32, i32
  }
  func.func @transform_2(%arg0: i32) -> (i32, i32) {
    %c0_i32 = arith.constant 0 : i32
    %c0_i32_0 = arith.constant 0 : i32
    %c0_i32_1 = arith.constant 0 : i32
    return %c0_i32, %c0_i32_0 : i32, i32
  }
  func.func @transform_3(%arg0: i32) -> (i32, i32) {
    %c0_i32 = arith.constant 0 : i32
    %c0_i32_0 = arith.constant 0 : i32
    %c0_i32_1 = arith.constant 0 : i32
    return %c0_i32, %c0_i32_0 : i32, i32
  }
  func.func @transform_4(%arg0: i32) -> (i32, i32) {
    %c0_i32 = arith.constant 0 : i32
    %c0_i32_0 = arith.constant 0 : i32
    %c0_i32_1 = arith.constant 0 : i32
    return %c0_i32, %c0_i32_0 : i32, i32
  }
  func.func @transform_5(%arg0: i32) -> (i32, i32) {
    %c0_i32 = arith.constant 0 : i32
    %c0_i32_0 = arith.constant 0 : i32
    return %arg0, %c0_i32 : i32, i32
  }
  func.func @transform_6(%arg0: i32) -> (i32, i32) {
    %c0_i32 = arith.constant 0 : i32
    %c0_i32_0 = arith.constant 0 : i32
    return %arg0, %c0_i32 : i32, i32
  }
}

</mosaic_0001>

<bundles_post_ra>
// kernel: tpu_custom_call.1
= control target key start
LH: loop header
LB: loop body
LE: loop exit
PB: predicated region body
PF: predicated region fallthrough
CT: control target
= control target key end

     0   :  { %s1714_s0 = inlined_call_operand.hbm [shape: f32[16,32], index: 0, kind: input, shape index: {}]   ;;  %s1715_s1 = inlined_call_operand.hbm [shape: f32[2,8,32], index: 1, kind: input, shape index: {}]   ;;  %s1716_s2 = inlined_call_operand.hbm [shape: f32[32,32], index: 2, kind: input, shape index: {}]   ;;  %s1717_s3 = inlined_call_operand.hbm [shape: f32[32,32], index: 3, kind: input, shape index: {}]   ;;  %s1718_s4 = inlined_call_operand.hbm [shape: f32[32,32], index: 4, kind: input, shape index: {}]   ;;  %s1719_s5 = inlined_call_operand.hbm [shape: f32[16,32], index: 5, kind: output, shape index: {0}]   ;;  %s1720_s6 = inlined_call_operand.vmem [shape: f32[16,8], index: 6, kind: output, shape index: {1}]  }
   0x1   :  { %1725 = sst [smem:[#allocation17_spill]] %s1716_s2 }
   0x2   :  { %1726 = sst [smem:[#allocation18_spill]] %s1717_s3 }
   0x3   :  { %1727 = sst [smem:[#allocation19_spill]] %s1718_s4 }
   0x4   :  { %12 = vsyncpa [#allocation3], 0 }
   0x5   :  { %14 = vsyncpa [#allocation3 + $0x1], 0 }
   0x6   :  { %15 = vsyncpa [#allocation6], 0 }
   0x7   :  { %17 = vsyncpa [#allocation6 + $0x1], 0 }
   0x8   :  { %18 = vsyncpa [#allocation9], 0 }
   0x9   :  { %19 = vsyncpa [#allocation4], 0 }
   0xa   :  { %21 = vsyncpa [#allocation4 + $0x1], 0  ;;  %s1392_s21 = smov 0   ;;  %s1394_s22 = smov 0  }
   0xb   :  { %s1396_s23 = smov 0   ;;  %s1398_s24 = smov 0  }
   0xc LB: > { %s1413_s25 = sadd.s32 4294967295, %s1344_s24   ;;  %s919_s26 = sadd.s32 4294967294, %s1344_s24   ;;  %s1344_s24 = sphi %s1398_s24, %s1751_s24   ;;  %s1340_s23 = sphi %s1396_s23, %s1750_s23   ;;  %s1336_s22 = sphi %s1394_s22, %s1749_s22   ;;  %s1332_s21 = sphi %s1392_s21, %s1748_s21  }
   0xd   : > { %p47_p0 = scmp.ne.s32.totalorder %s1336_s22, %s1332_s21  ;;  %p1721_p1 = scmp.eq.s32.totalorder %s1413_s25, 0 }
   0xe   : > { %p166_p3 = scmp.eq.s32.totalorder %s919_s26, 1  ;;  %p920_p5 = scmp.ge.s32.totalorder %s1344_s24, 1 }
   0xf   : > { %p1422_p4 = por %p1721_p1, %p47_p0  ;;  %p199_p7 = scmp.lt.s32.totalorder %s1344_s24, 3 }
  0x10   : > { %p1427_p6 = por %p166_p3, %p47_p0  ;;  %s1346_s30 = smov [#allocation7]  }
  0x11   : > { %s1728_s27 = scalar_select %p1422_p4, 1, 0 }
  0x12   : > { %s1729_s28 = scalar_select %p1427_p6, 1, 0 }
  0x13   : > { %p1432_p8 = pnand %p920_p5, %p199_p7  ;;  %s211_s7 = sshll.u32 %s1346_s30, 4  ;;  %s1436_s7 = int_to_ptr.vmem [resolvable:$true] %s211_s7 }
  0x14   : > { %s1347_s9 = smov [#allocation8]   ;;  %s1348_s11 = smov [#allocation10]  }
  0x15   : > { %s1730_s29 = scalar_select %p1432_p8, 1, 0 }
  0x16   : > { %p1047_p9 = pneg %p1432_p8  ;;  %s224_s10 = sshll.u32 %s1347_s9, 4  ;;  %s1447_s10 = int_to_ptr.vmem [resolvable:$true] %s224_s10 }
  0x17   : > { %s1449_s12 = sshll.u32 %s1348_s11, 4  ;;  %s1732_s2 = sld [smem:[#allocation17_spill]]  ;;  %s238_s12 = int_to_ptr.vmem [resolvable:$true] %s1449_s12 }
  0x18   : > { %p1443_p11 = pnand %p1047_p9, %p1721_p1 }
  0x1a   : > { %p1459_p13 = pneg %p1443_p11 }
  0x1d   : > { %s1122_s15 = scalar_lea.hbm %s1732_s2, 512 }
  0x1e   : > { %p1123_p12 = scmp.ne.s32.totalorder %s1732_s2, %s1122_s15  ;;  %p1129_p5 = scmp.lt.u32.totalorder %s1122_s15, %s1732_s2 }
  0x20   : > { %p1125_p0 = pnand %p1459_p13, %p1123_p12 }
  0x22   : > { %p1126_p3 = pneg %p1125_p0 }
  0x24   : > { %p1131_p7 = pnand %p1129_p5, %p1126_p3 }
  0x26   : > { %1134 = shalt.err (!%p1131_p7)
}
  0x27   : > { %s1135_s26 = scalar_lea.vmem %s1436_s7, 512  ;;  %p1143_p2 = scmp.lt.s32.totalorder %s1436_s7, %s1436_s7 }
  0x28   : > { %p1136_p9 = scmp.ne.s32.totalorder %s1436_s7, %s1135_s26  ;;  %p1144_p6 = scmp.lt.s32.totalorder %s1135_s26, %s1135_s26 }
  0x2a   : > { %p1138_p10 = pnand %p1136_p9, %p1459_p13  ;;  %p1145_p12 = por %p1144_p6, %p1143_p2 }
  0x2c   : > { %p1139_p1 = pneg %p1138_p10 }
  0x2e   : > { %p1146_p0 = pnand %p1145_p12, %p1139_p1 }
  0x30   : > { %1149 = shalt.err (!%p1146_p0)
}
  0x31   : > { %s1349_s30 = smov 128   ;;  %s1350_s9 = smov 8  }
  0x32   : > { %1050 = dma.hbm_to_vmem [thread:$0]  (!%p1443_p11), %s1732_s2, 512, %s1436_s7, [#allocation6], %s1349_s30, %s1349_s30, %s1350_s9  }
  0x33   : > { %s1734_s3 = sld [smem:[#allocation18_spill]] }
  0x39   : > { %s1150_s16 = scalar_lea.hbm %s1734_s3, 512 }
  0x3a   : > { %p1151_p1 = scmp.ne.s32.totalorder %s1734_s3, %s1150_s16  ;;  %p1157_p10 = scmp.lt.u32.totalorder %s1150_s16, %s1734_s3 }
  0x3c   : > { %p1153_p2 = pnand %p1151_p1, %p1459_p13 }
  0x3e   : > { %p1154_p6 = pneg %p1153_p2 }
  0x40   : > { %p1159_p3 = pnand %p1157_p10, %p1154_p6 }
  0x42   : > { %1162 = shalt.err (!%p1159_p3)
}
  0x43   : > { %s1163_s7 = scalar_lea.vmem %s1447_s10, 512  ;;  %p1171_p12 = scmp.lt.s32.totalorder %s1447_s10, %s1447_s10 }
  0x44   : > { %p1164_p5 = scmp.ne.s32.totalorder %s1447_s10, %s1163_s7  ;;  %p1172_p0 = scmp.lt.s32.totalorder %s1163_s7, %s1163_s7 }
  0x46   : > { %p1166_p7 = pnand %p1164_p5, %p1459_p13  ;;  %p1173_p1 = por %p1172_p0, %p1171_p12 }
  0x48   : > { %p1167_p9 = pneg %p1166_p7 }
  0x4a   : > { %p1174_p2 = pnand %p1173_p1, %p1167_p9 }
  0x4c   : > { %1177 = shalt.err (!%p1174_p2)
}
  0x4d   : > { %1053 = dma.hbm_to_vmem [thread:$0]  (!%p1443_p11), %s1734_s3, 512, %s1447_s10, [#allocation9], %s1349_s30, %s1349_s30, %s1350_s9  }
  0x4e   : > { %s1735_s4 = sld [smem:[#allocation19_spill]] }
  0x54   : > { %s1178_s16 = scalar_lea.hbm %s1735_s4, 512 }
  0x55   : > { %p1179_p6 = scmp.ne.s32.totalorder %s1735_s4, %s1178_s16  ;;  %p1185_p5 = scmp.lt.u32.totalorder %s1178_s16, %s1735_s4 }
  0x57   : > { %p1181_p10 = pnand %p1179_p6, %p1459_p13 }
  0x59   : > { %p1182_p3 = pneg %p1181_p10 }
  0x5b   : > { %p1187_p7 = pnand %p1185_p5, %p1182_p3 }
  0x5d   : > { %1190 = shalt.err (!%p1187_p7)
}
  0x5e   : > { %s1191_s7 = scalar_lea.vmem %s238_s12, 512  ;;  %p1199_p1 = scmp.lt.s32.totalorder %s238_s12, %s238_s12 }
  0x5f   : > { %p1192_p9 = scmp.ne.s32.totalorder %s238_s12, %s1191_s7  ;;  %p1200_p2 = scmp.lt.s32.totalorder %s1191_s7, %s1191_s7 }
  0x61   : > { %p1194_p12 = pnand %p1192_p9, %p1459_p13  ;;  %p1201_p4 = por %p1200_p2, %p1199_p1 }
  0x63   : > { %p1195_p0 = pneg %p1194_p12 }
  0x65   : > { %p1202_p8 = pnand %p1201_p4, %p1195_p0 }
  0x67   : > { %1205 = shalt.err (!%p1202_p8)
}
  0x68   : > { %1056 = dma.hbm_to_vmem [thread:$0]  (!%p1443_p11), %s1735_s4, 512, %s238_s12, [#allocation9], %s1349_s30, %s1349_s30, %s1350_s9  }
  0x69   : > { %s1532_s18 = sadd.s32 1, %s1344_s24   ;;  %s34_s13 = sadd.s32 1, %s1340_s23 }
  0x6a   : > { %s31_s8 = ssub.s32 %s1344_s24, %s1532_s18  ;;  %p41_p8 = scmp.ne.s32.totalorder %s1340_s23, %s1336_s22 }
  0x6b   : > { %p32_p4 = scmp.eq.s32.totalorder %s31_s8, 0  ;;  %p42_p13 = scmp.eq.s32.totalorder %s1344_s24, 0 }
  0x6c   : > { %p1071_p6 = scmp.lt.s32.totalorder %s1344_s24, 2  ;;  %p1736_p3 = scmp.eq.s32.totalorder %s1413_s25, 1 }
  0x6d   : > { %s1542_s14 = scalar_select %p32_p4, %s1340_s23, %s34_s13  }
  0x6e   : > { %p43_p10 = por %p42_p13, %p41_p8  ;;  %p1546_p5 = por %p1736_p3, %p41_p8 }
  0x6f   : > { %s251_s16 = sand.u32 1, %s1340_s23   ;;  %s926_s17 = sshll.u32 %s1344_s24, 7 }
  0x70   : > { %s1737_s15 = scalar_select %p1546_p5, 1, 0 }
  0x71   : > { %s1552_s12 = sshll.u32 %s251_s16, 3  ;;  %s1557_s19 = scalar_lea.hbm %s1714_s0, %s926_s17 }
  0x72   : > { %s255_s20 = scalar_lea.vmem [#allocation2], %s1552_s12  ;;  %p1560_p11 = pnand %p1071_p6, %p43_p10 }
  0x73   : > { %s262_s26 = sshll.u32 %s255_s20, 4  ;;  %s1569_s8 = scalar_lea.hbm %s1715_s1, %s926_s17  ;;  %s1564_s26 = int_to_ptr.vmem [resolvable:$true] %s262_s26 }
  0x74   : > { %s252_s13 = scalar_lea.sflag [#allocation3], %s251_s16  ;;  %s1206_s30 = scalar_lea.hbm %s1557_s19, 128 }
  0x75   : > { %p1207_p7 = scmp.ne.s32.totalorder %s1557_s19, %s1206_s30  ;;  %p1208_p9 = pneg %p1560_p11 }
  0x76   : > { %s1211_s2 = scalar_lea.hbm %s1714_s0, 256  ;;  %p1212_p1 = scmp.lt.u32.totalorder %s1557_s19, %s1714_s0 }
  0x77   : > { %p1209_p12 = pnand %p1208_p9, %p1207_p7  ;;  %p1213_p2 = scmp.lt.u32.totalorder %s1211_s2, %s1206_s30 }
  0x78   : > { %p1215_p8 = scmp.lt.u32.totalorder %s1206_s30, %s1557_s19 }
  0x79   : > { %p1210_p0 = pneg %p1209_p12  ;;  %p1214_p4 = por %p1213_p2, %p1212_p1 }
  0x7b   : > { %p1216_p13 = por %p1215_p8, %p1214_p4 }
  0x7d   : > { %p1217_p6 = pnand %p1216_p13, %p1210_p0 }
  0x7f   : > { %1220 = shalt.err (!%p1217_p6)
}
  0x80   : > { %s1221_s16 = scalar_lea.vmem %s1564_s26, 128  ;;  %s1351_s17 = smov [#allocation2]  }
  0x81   : > { %p1222_p10 = scmp.ne.s32.totalorder %s1564_s26, %s1221_s16  ;;  %s1226_s10 = sshll.u32 %s1351_s17, 4  ;;  %s1227_s10 = int_to_ptr.vmem [resolvable:$false] %s1226_s10 }
  0x82   : > { %s1228_s3 = scalar_lea.vmem %s1227_s10, 256  ;;  %p1229_p12 = scmp.lt.s32.totalorder %s1564_s26, %s1227_s10 }
  0x83   : > { %p1224_p3 = pnand %p1222_p10, %p1208_p9  ;;  %p1230_p1 = scmp.lt.s32.totalorder %s1228_s3, %s1221_s16 }
  0x85   : > { %p1225_p7 = pneg %p1224_p3  ;;  %p1231_p2 = por %p1230_p1, %p1229_p12 }
  0x87   : > { %p1232_p4 = pnand %p1231_p2, %p1225_p7 }
  0x89   : > { %1235 = shalt.err (!%p1232_p4)
}
  0x8a   : > { %1060 = dma.hbm_to_vmem [thread:$0]  (!%p1560_p11), %s1557_s19, 128, %s1564_s26, %s252_s13  }
  0x8b   : > { %s269_s2 = sand.u32 1, %s1344_s24   ;;  %s273_s4 = scalar_lea.vmem [#allocation5], %s1552_s12 }
  0x8c   : > { %s280_s11 = sshll.u32 %s273_s4, 4  ;;  %s270_s30 = scalar_lea.sflag [#allocation6], %s269_s2  ;;  %s281_s11 = int_to_ptr.vmem [resolvable:$true] %s280_s11 }
  0x8d   : > { %s1236_s9 = scalar_lea.hbm %s1569_s8, 128  ;;  %s1241_s17 = scalar_lea.hbm %s1715_s1, 256 }
  0x8e   : > { %p1237_p0 = scmp.ne.s32.totalorder %s1569_s8, %s1236_s9  ;;  %p1242_p6 = scmp.lt.u32.totalorder %s1569_s8, %s1715_s1 }
  0x8f   : > { %p1243_p10 = scmp.lt.u32.totalorder %s1241_s17, %s1236_s9  ;;  %p1245_p7 = scmp.lt.u32.totalorder %s1236_s9, %s1569_s8 }
  0x90   : > { %p1239_p8 = pnand %p1237_p0, %p1208_p9 }
  0x91   : > { %p1244_p3 = por %p1243_p10, %p1242_p6 }
  0x92   : > { %p1240_p13 = pneg %p1239_p8 }
  0x93   : > { %p1246_p12 = por %p1245_p7, %p1244_p3 }
  0x95   : > { %p1247_p1 = pnand %p1246_p12, %p1240_p13 }
  0x97   : > { %1250 = shalt.err (!%p1247_p1)
}
  0x98   : > { %s1251_s12 = scalar_lea.vmem %s281_s11, 128  ;;  %s1352_s19 = smov [#allocation5]  }
  0x99   : > { %p1252_p2 = scmp.ne.s32.totalorder %s281_s11, %s1251_s12  ;;  %s1256_s26 = sshll.u32 %s1352_s19, 4  ;;  %s1257_s26 = int_to_ptr.vmem [resolvable:$false] %s1256_s26 }
  0x9a   : > { %s1258_s13 = scalar_lea.vmem %s1257_s26, 256  ;;  %p1259_p8 = scmp.lt.s32.totalorder %s281_s11, %s1257_s26 }
  0x9b   : > { %p1254_p4 = pnand %p1252_p2, %p1208_p9  ;;  %p1260_p5 = scmp.lt.s32.totalorder %s1258_s13, %s1251_s12 }
  0x9d   : > { %p1255_p0 = pneg %p1254_p4  ;;  %p1261_p6 = por %p1260_p5, %p1259_p8 }
  0x9f   : > { %p1262_p10 = pnand %p1261_p6, %p1255_p0 }
  0xa1   : > { %1265 = shalt.err (!%p1262_p10)
}
  0xa2   : > { %1063 = dma.hbm_to_vmem [thread:$0]  (!%p1560_p11), %s1569_s8, 128, %s281_s11, %s270_s30  }
  0xa3   : > { %p1739_p13 = scmp.ne.s32.totalorder %s1730_s29, 0 }
  0xa4   : > { %s1620_s2 = sand.u32 (!%p1739_p13), 1, %s1336_s22   ;;  %p1740_p5 = scmp.ne.s32.totalorder (!%p1739_p13), %s1728_s27, 0 }
  0xa5   : > { %289 = sbr.rel (%p1739_p13) target bundleno = 1380 (0x564), region = 40  ;;  %s1623_s4 = sshll.u32 (!%p1739_p13), %s1620_s2, 3 }
  0xa6   : > { %s292_s9 = scalar_lea.sflag (!%p1739_p13), [#allocation3], %s1620_s2  ;;  %s295_s20 = scalar_lea.vmem (!%p1739_p13), [#allocation2], %s1623_s4 }
  0xac   : > { %1311 = dma.done.wait (%p1740_p5), %s292_s9, 128  }
  0xad   : > { %1313 = vsyncadd (%p1740_p5), %s292_s9, 4294967168  ;;  %s300_s29 = sand.u32 1, %s1413_s25   ;;  %s304_s8 = scalar_lea.vmem [#allocation5], %s1623_s4 }
  0xae   : > { %s301_s7 = scalar_lea.sflag [#allocation6], %s300_s29 }
  0xaf   : > { %1315 = dma.done.wait (%p1740_p5), %s301_s7, 128  }
  0xb0   : > { %1317 = vsyncadd (%p1740_p5), %s301_s7, 4294967168  ;;  %p1741_p11 = scmp.eq.s32.totalorder %s1413_s25, 0 }
  0xb2   : > { %1319 = dma.done.wait (%p1741_p11), [#allocation6], 512   ;;  %p1742_p9 = pmov %p1741_p11 }
  0xb4   : > { %1321 = vsyncadd (%p1742_p9), [#allocation6], 4294966784  ;;  %p1743_p3 = pmov %p1742_p9 }
  0xb6   : > { %1323 = dma.done.wait (%p1743_p3), [#allocation9], 1024   ;;  %p1744_p7 = pmov %p1743_p3 }
  0xb7   : > { %v1353_v0 = vmov 0.0|0.0   ;;  %vm1354_vm0 = vmmov 0   ;;  %v1355_v1 = vmov 0.0   ;;  %v360_v2 = vld [vmem:[#allocation7] sm:$0xff]  ;;  %v361_v3 = vld [vmem:[#allocation7 + $0x8] sm:$0xff]  ;;  %v362_v4 = vld [vmem:[#allocation7 + $0x10] sm:$0xff] }
  0xb8   : > { %1325 = vsyncadd (%p1744_p7), [#allocation9], 4294966272  ;;  %1009 = vmatprep.subr.bf16.mxu1 %v1353_v0  ;;  %974 = vmatprep.mubr.msk.f32.mxu1 %vm1354_vm0, %v1355_v1  ;;  %v1010_v5 = vpack.c.bf16 %v361_v3, %v360_v2  ;;  %v363_v6 = vld [vmem:[#allocation7 + $0x18] sm:$0xff]  ;;  %v358_v8 = vld [vmem:[%s295_s20] sm:$0xff]  ;;  %vm364_vm1 = vcmask 261120   ;;  %vm514_vm2 = vcmask 64512  }
  0xb9   : > { %1015 = vmatprep.subr.bf16.mxu0 %v1353_v0  ;;  %995 = vmatprep.mubr.msk.f32.mxu0 %vm1354_vm0, %v1355_v1  ;;  %v1013_v7 = vpack.c.bf16 %v363_v6, %v362_v4  ;;  %v359_v9 = vld [vmem:[%s304_s8] sm:$0xff]  ;;  %v604_v20 = vld [vmem:[#allocation10] sm:$0xff]  ;;  %v605_v21 = vld [vmem:[#allocation10 + $0x8] sm:$0xff]  ;;  %p354_p12 = scmp.lt.s32.totalorder %s1413_s25, 1  ;;  %s944_s10 = sshll.u32 %s1413_s25, 7 }
  0xba   : > { %1011 = vmatpush3.bf16.msra.mxu1 %v1010_v5  ;;  %v606_v22 = vld [vmem:[#allocation10 + $0x10] sm:$0xff]  ;;  %v1016_v23 = vpack.c.bf16 %v605_v21, %v604_v20  ;;  %v607_v24 = vld [vmem:[#allocation10 + $0x18] sm:$0xff]  ;;  %v600_v26 = vld [vmem:[#allocation8] sm:$0xff]  ;;  %s347_s3 = scalar_lea.vmem [#allocation11], %s1623_s4  ;;  %s1669_s13 = scalar_lea.hbm %s1719_s5, %s944_s10 }
  0xbb   : > { %1012 = vmatprep.subr.bf16.mxu1 %v1353_v0  ;;  %v1019_v25 = vpack.c.bf16 %v607_v24, %v606_v22  ;;  %v601_v27 = vld [vmem:[#allocation8 + $0x8] sm:$0xff]  ;;  %v602_v29 = vld [vmem:[#allocation8 + $0x10] sm:$0xff]  ;;  %v603_v30 = vld [vmem:[#allocation8 + $0x18] sm:$0xff]  ;;  %s355_s27 = scalar_select %p354_p12, %s1413_s25, 1 }
  0xbc   : > { %1017 = vmatpush3.bf16.msra.mxu0 %v1016_v23  ;;  %v1022_v28 = vpack.c.bf16 %v601_v27, %v600_v26  ;;  %v1025_v31 = vpack.c.bf16 %v603_v30, %v602_v29  ;;  %s771_s12 = sshll.u32 %s347_s3, 4  ;;  %s754_s9 = scalar_lea.sflag [#allocation4], %s1620_s2  ;;  %s1671_s12 = int_to_ptr.vmem [resolvable:$true] %s771_s12 }
  0xbd   : > { %1018 = vmatprep.subr.bf16.mxu0 %v1353_v0  ;;  %s936_s11 = sshll.u32 %s355_s27, 3  ;;  %s1266_s20 = scalar_lea.vmem %s1671_s12, 128 }
  0xbe   : > { %1014 = vmatpush3.bf16.msra.mxu1 %v1013_v7  ;;  %s357_s17 = scalar_lea.vmem %s1720_s6, %s936_s11  ;;  %p1267_p1 = scmp.ne.s32.totalorder %s1671_s12, %s1266_s20 }
  0xbf   : > { %977 = vmatprep.subr.mxu1 %v1355_v1  ;;  %p1745_p2 = scmp.ne.s32.totalorder %s1737_s15, 0  ;;  %s1356_s25 = smov [#allocation11]  }
  0xc0   : > { %1020 = vmatpush3.bf16.msra.mxu0 %v1019_v25  ;;  %s1270_s4 = sshll.u32 %s1356_s25, 4  ;;  %s1271_s4 = int_to_ptr.vmem [resolvable:$false] %s1270_s4 }
  0xc1   : > { %975 = vmatmul.mubr.msk.f32.vlgmr.msra.gmra.mrb[0].mxu1 %vm364_vm1, %v358_v8  ;;  %1021 = vmatprep.subr.bf16.mxu0 %v1353_v0  ;;  %p1268_p4 = pnand %p1267_p1, %p1745_p2  ;;  %s1272_s29 = scalar_lea.vmem %s1271_s4, 256 }
  0xc2   : > { %979 = vmatprep.mubr.msk.f32.mxu1 %vm1354_vm0, %v1355_v1  ;;  %p1273_p8 = scmp.lt.s32.totalorder %s1671_s12, %s1271_s4  ;;  %p1274_p6 = scmp.lt.s32.totalorder %s1272_s29, %s1266_s20 }
  0xc3   : > { %996 = vmatmul.mubr.msk.f32.vlgmr.msra.gmra.mrb[0].mxu0 %vm364_vm1, %v358_v8  ;;  %p1269_p0 = pneg %p1268_p4 }
  0xc4   : > { %1023 = vmatpush3.bf16.msra.mxu0 %v1022_v28  ;;  %1006 = vmatprep.mubr.msk.f32.mxu0 %vm1354_vm0, %v1355_v1  ;;  %p1275_p10 = por %p1274_p6, %p1273_p8 }
  0xc5   : > { %1024 = vmatprep.subr.bf16.mxu0 %v1353_v0 }
  0xc6   : > { %p1276_p13 = pnand %p1275_p10, %p1269_p0 }
  0xc7   : > { %978 = vmatpush3.xpose.msk.msra.mxu1 %vm364_vm1, %v359_v9 }
  0xc8   : > { %982 = vmatprep.subr.mxu1 %v1355_v1  ;;  %1026 = vmatpush3.bf16.msra.mxu0 %v1025_v31 }
 0x194   : > { %v434_v10 = vpop.f32.mrb[0].mxu1 }
 0x195   : > { %v976_v11 = vpop.f32.mrb[1].mxu1  ;;  %980 = vmatmul.mubr.msk.f32.vlgmr.msra.gmra.mrb[2].mxu1 %vm364_vm1, %v434_v10 }
 0x196   : > { %983 = vmatpush3.msra.mxu1 %v359_v9  ;;  %984 = vmatprep.mubr.msk.f32.mxu1 %vm1354_vm0, %v1355_v1 }
 0x268   : > { %v510_v12 = vpop.f32.mrb[2].mxu1 }
 0x269   : > { %v981_v13 = vpop.f32.mrb[3].mxu1  ;;  %v515_v14 = vsel %vm514_vm2, %v510_v12, -inf }
 0x26a   : > { %516 = vmax.xlane.f32.xlu0 %v515_v14 }
 0x2f7   : > { %v517_v15 = vpop.xlane.xlu0 %516 }
 0x2f8   : > { %v518_v16 = vsub.f32 %v510_v12, %v517_v15 }
 0x2fa   : > { %v519_v17 = vmul.f32 1.442695, %v518_v16 }
 0x2fc   : > { %1116 = vpow2.f32 %v519_v17 }
 0x306   : > { %v1117_v18 = vpop.eup %1116 }
 0x307   : > { %v521_v19 = vsel %vm514_vm2, %v1117_v18, 0.0 }
 0x308   : > { %522 = vadd.xlane.f32.xlu0 %v521_v19 }
 0x395   : > { %v523_v32 = vpop.xlane.xlu0 %522 }
 0x396   : > { %1118 = vrcp.f32 %v523_v32 }
 0x3a0   : > { %v1119_v33 = vpop.eup %1118 }
 0x3a1   : > { %v525_v34 = vmul.f32 %v1119_v33, %v1117_v18 }
 0x3a3   : > { %526 = vst.msk [vmem:[%s357_s17] sm:$0xff] %vm514_vm2, %v525_v34  ;;  %985 = vmatmul.mubr.msk.f32.vlgmr.msra.gmra.mrb[4].mxu1 %vm514_vm2, %v525_v34 }
 0x476   : > { %v596_v35 = vpop.f32.mrb[4].mxu1 }
 0x477   : > { %v986_v36 = vpop.f32.mrb[5].mxu1  ;;  %1007 = vmatmul.mubr.msk.f32.vlgmr.msra.gmra.mrb[0].mxu0 %vm364_vm1, %v596_v35 }
 0x54a   : > { %v747_v37 = vpop.f32.mrb[0].mxu0 }
 0x54b   : > { %1120 = vtanh.f32 %v747_v37  ;;  %v1008_v38 = vpop.f32.mrb[1].mxu0 }
 0x555   : > { %v1121_v39 = vpop.eup %1120 }
 0x556   : > { %752 = vst.msk [vmem:[%s347_s3] sm:$0xff] %vm364_vm1, %v1121_v39 }
 0x557   : > { %1279 = shalt.err (!%p1276_p13)
}
 0x558   : > { %s1280_s2 = scalar_lea.hbm %s1669_s13, 128  ;;  %s1284_s27 = scalar_lea.hbm %s1719_s5, 256 }
 0x559   : > { %p1281_p5 = scmp.ne.s32.totalorder %s1669_s13, %s1280_s2  ;;  %p1285_p3 = scmp.lt.u32.totalorder %s1669_s13, %s1719_s5 }
 0x55a   : > { %p1286_p7 = scmp.lt.u32.totalorder %s1284_s27, %s1280_s2  ;;  %p1288_p1 = scmp.lt.u32.totalorder %s1280_s2, %s1669_s13 }
 0x55b   : > { %p1282_p11 = pnand %p1281_p5, %p1745_p2 }
 0x55c   : > { %p1287_p12 = por %p1286_p7, %p1285_p3 }
 0x55d   : > { %p1283_p9 = pneg %p1282_p11 }
 0x55e   : > { %p1289_p4 = por %p1288_p1, %p1287_p12 }
 0x560   : > { %p1290_p0 = pnand %p1289_p4, %p1283_p9 }
 0x562   : > { %1293 = shalt.err (!%p1290_p0)
}
 0x563   : > { %1045 = dma.vmem_to_hbm [thread:$0]  (%p1745_p2), %s1671_s12, 128, %s1669_s13, %s754_s9  }
 0x564 PF: > { %s786_s16 = sand.u32 1, %s1332_s21   ;;  %p1746_p8 = scmp.ne.s32.totalorder %s1729_s28, 0 }
 0x565   : > { %p1747_p6 = scmp.ge.s32.totalorder %s1344_s24, 2  ;;  %s787_s17 = scalar_lea.sflag [#allocation4], %s786_s16 }
 0x567   : > { %p1065_p10 = pnand %p1747_p6, %p1746_p8 }
 0x569   : > { %1327 = dma.done.wait (!%p1065_p10), %s787_s17, 128  }
 0x56a   : > { %1329 = vsyncadd (!%p1065_p10), %s787_s17, 4294967168  ;;  %p24_p13 = scmp.ge.s32.totalorder %s1532_s18, 4   ;;  %s1748_s21 = smov %s1336_s22 }
 0x56b   : > { %s1749_s22 = smov %s1340_s23  ;;  %s1750_s23 = smov %s1542_s14 }
 0x56c   : > { %s1751_s24 = smov %s1532_s18  ;;  %26 = sbr.rel (!%p24_p13) target bundleno = 12 (0xc), region = 122 }
 0x573   :  { %799 = vsyncpa [#allocation3], 1 }
 0x574   :  { %801 = vsyncpa [#allocation3 + $0x1], 1 }
 0x575   :  { %802 = vsyncpa [#allocation6], 1 }
 0x576   :  { %804 = vsyncpa [#allocation6 + $0x1], 1 }
 0x577   :  { %805 = vsyncpa [#allocation9], 1 }
 0x578   :  { %806 = vsyncpa [#allocation4], 1 }
 0x579   :  { %808 = vsyncpa [#allocation4 + $0x1], 1 }

// kernel: tpu_custom_call.1
= control target key start
LH: loop header
LB: loop body
LE: loop exit
PB: predicated region body
PF: predicated region fallthrough
CT: control target
= control target key end

     0   :  { %s1714_s0 = inlined_call_operand.hbm [shape: f32[16,32], index: 0, kind: input, shape index: {}]   ;;  %s1715_s1 = inlined_call_operand.hbm [shape: f32[2,8,32], index: 1, kind: input, shape index: {}]   ;;  %s1716_s2 = inlined_call_operand.hbm [shape: f32[32,32], index: 2, kind: input, shape index: {}]   ;;  %s1717_s3 = inlined_call_operand.hbm [shape: f32[32,32], index: 3, kind: input, shape index: {}]   ;;  %s1718_s4 = inlined_call_operand.hbm [shape: f32[32,32], index: 4, kind: input, shape index: {}]   ;;  %s1719_s5 = inlined_call_operand.hbm [shape: f32[16,32], index: 5, kind: output, shape index: {0}]   ;;  %s1720_s6 = inlined_call_operand.vmem [shape: f32[16,8], index: 6, kind: output, shape index: {1}]  }
   0x1   :  { %1725 = sst [smem:[#allocation17_spill]] %s1716_s2 }
   0x2   :  { %1726 = sst [smem:[#allocation18_spill]] %s1717_s3 }
   0x3   :  { %1727 = sst [smem:[#allocation19_spill]] %s1718_s4 }
   0x4   :  { %12 = vsyncpa [#allocation3], 0 }
   0x5   :  { %14 = vsyncpa [#allocation3 + $0x1], 0 }
   0x6   :  { %15 = vsyncpa [#allocation6], 0 }
   0x7   :  { %17 = vsyncpa [#allocation6 + $0x1], 0 }
   0x8   :  { %18 = vsyncpa [#allocation9], 0 }
   0x9   :  { %19 = vsyncpa [#allocation4], 0 }
   0xa   :  { %21 = vsyncpa [#allocation4 + $0x1], 0  ;;  %s1392_s21 = smov 0   ;;  %s1394_s22 = smov 0  }
   0xb   :  { %s1396_s23 = smov 0   ;;  %s1398_s24 = smov 0  }
   0xc LB: > { %s1413_s25 = sadd.s32 4294967295, %s1344_s24   ;;  %s919_s26 = sadd.s32 4294967294, %s1344_s24   ;;  %s1344_s24 = sphi %s1398_s24, %s1751_s24   ;;  %s1340_s23 = sphi %s1396_s23, %s1750_s23   ;;  %s1336_s22 = sphi %s1394_s22, %s1749_s22   ;;  %s1332_s21 = sphi %s1392_s21, %s1748_s21  }
   0xd   : > { %p47_p0 = scmp.ne.s32.totalorder %s1336_s22, %s1332_s21  ;;  %p1721_p1 = scmp.eq.s32.totalorder %s1413_s25, 0 }
   0xe   : > { %p166_p3 = scmp.eq.s32.totalorder %s919_s26, 1  ;;  %p920_p5 = scmp.ge.s32.totalorder %s1344_s24, 1 }
   0xf   : > { %p1422_p4 = por %p1721_p1, %p47_p0  ;;  %p199_p7 = scmp.lt.s32.totalorder %s1344_s24, 3 }
  0x10   : > { %p1427_p6 = por %p166_p3, %p47_p0  ;;  %s1346_s30 = smov [#allocation7]  }
  0x11   : > { %s1728_s27 = scalar_select %p1422_p4, 1, 0 }
  0x12   : > { %s1729_s28 = scalar_select %p1427_p6, 1, 0 }
  0x13   : > { %p1432_p8 = pnand %p920_p5, %p199_p7  ;;  %s211_s7 = sshll.u32 %s1346_s30, 4  ;;  %s1436_s7 = int_to_ptr.vmem [resolvable:$true] %s211_s7 }
  0x14   : > { %s1347_s9 = smov [#allocation8]   ;;  %s1348_s11 = smov [#allocation10]  }
  0x15   : > { %s1730_s29 = scalar_select %p1432_p8, 1, 0 }
  0x16   : > { %p1047_p9 = pneg %p1432_p8  ;;  %s224_s10 = sshll.u32 %s1347_s9, 4  ;;  %s1447_s10 = int_to_ptr.vmem [resolvable:$true] %s224_s10 }
  0x17   : > { %s1449_s12 = sshll.u32 %s1348_s11, 4  ;;  %s1732_s2 = sld [smem:[#allocation17_spill]]  ;;  %s238_s12 = int_to_ptr.vmem [resolvable:$true] %s1449_s12 }
  0x18   : > { %p1443_p11 = pnand %p1047_p9, %p1721_p1 }
  0x1a   : > { %p1459_p13 = pneg %p1443_p11 }
  0x1d   : > { %s1122_s15 = scalar_lea.hbm %s1732_s2, 512 }
  0x1e   : > { %p1123_p12 = scmp.ne.s32.totalorder %s1732_s2, %s1122_s15  ;;  %p1129_p5 = scmp.lt.u32.totalorder %s1122_s15, %s1732_s2 }
  0x20   : > { %p1125_p0 = pnand %p1459_p13, %p1123_p12 }
  0x22   : > { %p1126_p3 = pneg %p1125_p0 }
  0x24   : > { %p1131_p7 = pnand %p1129_p5, %p1126_p3 }
  0x26   : > { %1134 = shalt.err (!%p1131_p7)
}
  0x27   : > { %s1135_s26 = scalar_lea.vmem %s1436_s7, 512  ;;  %p1143_p2 = scmp.lt.s32.totalorder %s1436_s7, %s1436_s7 }
  0x28   : > { %p1136_p9 = scmp.ne.s32.totalorder %s1436_s7, %s1135_s26  ;;  %p1144_p6 = scmp.lt.s32.totalorder %s1135_s26, %s1135_s26 }
  0x2a   : > { %p1138_p10 = pnand %p1136_p9, %p1459_p13  ;;  %p1145_p12 = por %p1144_p6, %p1143_p2 }
  0x2c   : > { %p1139_p1 = pneg %p1138_p10 }
  0x2e   : > { %p1146_p0 = pnand %p1145_p12, %p1139_p1 }
  0x30   : > { %1149 = shalt.err (!%p1146_p0)
}
  0x31   : > { %s1349_s30 = smov 128   ;;  %s1350_s9 = smov 8  }
  0x32   : > { %1050 = dma.hbm_to_vmem [thread:$0]  (!%p1443_p11), %s1732_s2, 512, %s1436_s7, [#allocation6], %s1349_s30, %s1349_s30, %s1350_s9  }
  0x33   : > { %s1734_s3 = sld [smem:[#allocation18_spill]] }
  0x39   : > { %s1150_s16 = scalar_lea.hbm %s1734_s3, 512 }
  0x3a   : > { %p1151_p1 = scmp.ne.s32.totalorder %s1734_s3, %s1150_s16  ;;  %p1157_p10 = scmp.lt.u32.totalorder %s1150_s16, %s1734_s3 }
  0x3c   : > { %p1153_p2 = pnand %p1151_p1, %p1459_p13 }
  0x3e   : > { %p1154_p6 = pneg %p1153_p2 }
  0x40   : > { %p1159_p3 = pnand %p1157_p10, %p1154_p6 }
  0x42   : > { %1162 = shalt.err (!%p1159_p3)
}
  0x43   : > { %s1163_s7 = scalar_lea.vmem %s1447_s10, 512  ;;  %p1171_p12 = scmp.lt.s32.totalorder %s1447_s10, %s1447_s10 }
  0x44   : > { %p1164_p5 = scmp.ne.s32.totalorder %s1447_s10, %s1163_s7  ;;  %p1172_p0 = scmp.lt.s32.totalorder %s1163_s7, %s1163_s7 }
  0x46   : > { %p1166_p7 = pnand %p1164_p5, %p1459_p13  ;;  %p1173_p1 = por %p1172_p0, %p1171_p12 }
  0x48   : > { %p1167_p9 = pneg %p1166_p7 }
  0x4a   : > { %p1174_p2 = pnand %p1173_p1, %p1167_p9 }
  0x4c   : > { %1177 = shalt.err (!%p1174_p2)
}
  0x4d   : > { %1053 = dma.hbm_to_vmem [thread:$0]  (!%p1443_p11), %s1734_s3, 512, %s1447_s10, [#allocation9], %s1349_s30, %s1349_s30, %s1350_s9  }
  0x4e   : > { %s1735_s4 = sld [smem:[#allocation19_spill]] }
  0x54   : > { %s1178_s16 = scalar_lea.hbm %s1735_s4, 512 }
  0x55   : > { %p1179_p6 = scmp.ne.s32.totalorder %s1735_s4, %s1178_s16  ;;  %p1185_p5 = scmp.lt.u32.totalorder %s1178_s16, %s1735_s4 }
  0x57   : > { %p1181_p10 = pnand %p1179_p6, %p1459_p13 }
  0x59   : > { %p1182_p3 = pneg %p1181_p10 }
  0x5b   : > { %p1187_p7 = pnand %p1185_p5, %p1182_p3 }
  0x5d   : > { %1190 = shalt.err (!%p1187_p7)
}
  0x5e   : > { %s1191_s7 = scalar_lea.vmem %s238_s12, 512  ;;  %p1199_p1 = scmp.lt.s32.totalorder %s238_s12, %s238_s12 }
  0x5f   : > { %p1192_p9 = scmp.ne.s32.totalorder %s238_s12, %s1191_s7  ;;  %p1200_p2 = scmp.lt.s32.totalorder %s1191_s7, %s1191_s7 }
  0x61   : > { %p1194_p12 = pnand %p1192_p9, %p1459_p13  ;;  %p1201_p4 = por %p1200_p2, %p1199_p1 }
  0x63   : > { %p1195_p0 = pneg %p1194_p12 }
  0x65   : > { %p1202_p8 = pnand %p1201_p4, %p1195_p0 }
  0x67   : > { %1205 = shalt.err (!%p1202_p8)
}
  0x68   : > { %1056 = dma.hbm_to_vmem [thread:$0]  (!%p1443_p11), %s1735_s4, 512, %s238_s12, [#allocation9], %s1349_s30, %s1349_s30, %s1350_s9  }
  0x69   : > { %s1532_s18 = sadd.s32 1, %s1344_s24   ;;  %s34_s13 = sadd.s32 1, %s1340_s23 }
  0x6a   : > { %s31_s8 = ssub.s32 %s1344_s24, %s1532_s18  ;;  %p41_p8 = scmp.ne.s32.totalorder %s1340_s23, %s1336_s22 }
  0x6b   : > { %p32_p4 = scmp.eq.s32.totalorder %s31_s8, 0  ;;  %p42_p13 = scmp.eq.s32.totalorder %s1344_s24, 0 }
  0x6c   : > { %p1071_p6 = scmp.lt.s32.totalorder %s1344_s24, 2  ;;  %p1736_p3 = scmp.eq.s32.totalorder %s1413_s25, 1 }
  0x6d   : > { %s1542_s14 = scalar_select %p32_p4, %s1340_s23, %s34_s13  }
  0x6e   : > { %p43_p10 = por %p42_p13, %p41_p8  ;;  %p1546_p5 = por %p1736_p3, %p41_p8 }
  0x6f   : > { %s251_s16 = sand.u32 1, %s1340_s23   ;;  %s926_s17 = sshll.u32 %s1344_s24, 7 }
  0x70   : > { %s1737_s15 = scalar_select %p1546_p5, 1, 0 }
  0x71   : > { %s1552_s12 = sshll.u32 %s251_s16, 3  ;;  %s1557_s19 = scalar_lea.hbm %s1714_s0, %s926_s17 }
  0x72   : > { %s255_s20 = scalar_lea.vmem [#allocation2], %s1552_s12  ;;  %p1560_p11 = pnand %p1071_p6, %p43_p10 }
  0x73   : > { %s262_s26 = sshll.u32 %s255_s20, 4  ;;  %s1569_s8 = scalar_lea.hbm %s1715_s1, %s926_s17  ;;  %s1564_s26 = int_to_ptr.vmem [resolvable:$true] %s262_s26 }
  0x74   : > { %s252_s13 = scalar_lea.sflag [#allocation3], %s251_s16  ;;  %s1206_s30 = scalar_lea.hbm %s1557_s19, 128 }
  0x75   : > { %p1207_p7 = scmp.ne.s32.totalorder %s1557_s19, %s1206_s30  ;;  %p1208_p9 = pneg %p1560_p11 }
  0x76   : > { %s1211_s2 = scalar_lea.hbm %s1714_s0, 256  ;;  %p1212_p1 = scmp.lt.u32.totalorder %s1557_s19, %s1714_s0 }
  0x77   : > { %p1209_p12 = pnand %p1208_p9, %p1207_p7  ;;  %p1213_p2 = scmp.lt.u32.totalorder %s1211_s2, %s1206_s30 }
  0x78   : > { %p1215_p8 = scmp.lt.u32.totalorder %s1206_s30, %s1557_s19 }
  0x79   : > { %p1210_p0 = pneg %p1209_p12  ;;  %p1214_p4 = por %p1213_p2, %p1212_p1 }
  0x7b   : > { %p1216_p13 = por %p1215_p8, %p1214_p4 }
  0x7d   : > { %p1217_p6 = pnand %p1216_p13, %p1210_p0 }
  0x7f   : > { %1220 = shalt.err (!%p1217_p6)
}
  0x80   : > { %s1221_s16 = scalar_lea.vmem %s1564_s26, 128  ;;  %s1351_s17 = smov [#allocation2]  }
  0x81   : > { %p1222_p10 = scmp.ne.s32.totalorder %s1564_s26, %s1221_s16  ;;  %s1226_s10 = sshll.u32 %s1351_s17, 4  ;;  %s1227_s10 = int_to_ptr.vmem [resolvable:$false] %s1226_s10 }
  0x82   : > { %s1228_s3 = scalar_lea.vmem %s1227_s10, 256  ;;  %p1229_p12 = scmp.lt.s32.totalorder %s1564_s26, %s1227_s10 }
  0x83   : > { %p1224_p3 = pnand %p1222_p10, %p1208_p9  ;;  %p1230_p1 = scmp.lt.s32.totalorder %s1228_s3, %s1221_s16 }
  0x85   : > { %p1225_p7 = pneg %p1224_p3  ;;  %p1231_p2 = por %p1230_p1, %p1229_p12 }
  0x87   : > { %p1232_p4 = pnand %p1231_p2, %p1225_p7 }
  0x89   : > { %1235 = shalt.err (!%p1232_p4)
}
  0x8a   : > { %1060 = dma.hbm_to_vmem [thread:$0]  (!%p1560_p11), %s1557_s19, 128, %s1564_s26, %s252_s13  }
  0x8b   : > { %s269_s2 = sand.u32 1, %s1344_s24   ;;  %s273_s4 = scalar_lea.vmem [#allocation5], %s1552_s12 }
  0x8c   : > { %s280_s11 = sshll.u32 %s273_s4, 4  ;;  %s270_s30 = scalar_lea.sflag [#allocation6], %s269_s2  ;;  %s281_s11 = int_to_ptr.vmem [resolvable:$true] %s280_s11 }
  0x8d   : > { %s1236_s9 = scalar_lea.hbm %s1569_s8, 128  ;;  %s1241_s17 = scalar_lea.hbm %s1715_s1, 256 }
  0x8e   : > { %p1237_p0 = scmp.ne.s32.totalorder %s1569_s8, %s1236_s9  ;;  %p1242_p6 = scmp.lt.u32.totalorder %s1569_s8, %s1715_s1 }
  0x8f   : > { %p1243_p10 = scmp.lt.u32.totalorder %s1241_s17, %s1236_s9  ;;  %p1245_p7 = scmp.lt.u32.totalorder %s1236_s9, %s1569_s8 }
  0x90   : > { %p1239_p8 = pnand %p1237_p0, %p1208_p9 }
  0x91   : > { %p1244_p3 = por %p1243_p10, %p1242_p6 }
  0x92   : > { %p1240_p13 = pneg %p1239_p8 }
  0x93   : > { %p1246_p12 = por %p1245_p7, %p1244_p3 }
  0x95   : > { %p1247_p1 = pnand %p1246_p12, %p1240_p13 }
  0x97   : > { %1250 = shalt.err (!%p1247_p1)
}
  0x98   : > { %s1251_s12 = scalar_lea.vmem %s281_s11, 128  ;;  %s1352_s19 = smov [#allocation5]  }
  0x99   : > { %p1252_p2 = scmp.ne.s32.totalorder %s281_s11, %s1251_s12  ;;  %s1256_s26 = sshll.u32 %s1352_s19, 4  ;;  %s1257_s26 = int_to_ptr.vmem [resolvable:$false] %s1256_s26 }
  0x9a   : > { %s1258_s13 = scalar_lea.vmem %s1257_s26, 256  ;;  %p1259_p8 = scmp.lt.s32.totalorder %s281_s11, %s1257_s26 }
  0x9b   : > { %p1254_p4 = pnand %p1252_p2, %p1208_p9  ;;  %p1260_p5 = scmp.lt.s32.totalorder %s1258_s13, %s1251_s12 }
  0x9d   : > { %p1255_p0 = pneg %p1254_p4  ;;  %p1261_p6 = por %p1260_p5, %p1259_p8 }
  0x9f   : > { %p1262_p10 = pnand %p1261_p6, %p1255_p0 }
  0xa1   : > { %1265 = shalt.err (!%p1262_p10)
}
  0xa2   : > { %1063 = dma.hbm_to_vmem [thread:$0]  (!%p1560_p11), %s1569_s8, 128, %s281_s11, %s270_s30  }
  0xa3   : > { %p1739_p13 = scmp.ne.s32.totalorder %s1730_s29, 0 }
  0xa4   : > { %s1620_s2 = sand.u32 (!%p1739_p13), 1, %s1336_s22   ;;  %p1740_p5 = scmp.ne.s32.totalorder (!%p1739_p13), %s1728_s27, 0 }
  0xa5   : > { %289 = sbr.rel (%p1739_p13) target bundleno = 1380 (0x564), region = 40  ;;  %s1623_s4 = sshll.u32 (!%p1739_p13), %s1620_s2, 3 }
  0xa6   : > { %s292_s9 = scalar_lea.sflag (!%p1739_p13), [#allocation3], %s1620_s2  ;;  %s295_s20 = scalar_lea.vmem (!%p1739_p13), [#allocation2], %s1623_s4 }
  0xac   : > { %1311 = dma.done.wait (%p1740_p5), %s292_s9, 128  }
  0xad   : > { %1313 = vsyncadd (%p1740_p5), %s292_s9, 4294967168  ;;  %s300_s29 = sand.u32 1, %s1413_s25   ;;  %s304_s8 = scalar_lea.vmem [#allocation5], %s1623_s4 }
  0xae   : > { %s301_s7 = scalar_lea.sflag [#allocation6], %s300_s29 }
  0xaf   : > { %1315 = dma.done.wait (%p1740_p5), %s301_s7, 128  }
  0xb0   : > { %1317 = vsyncadd (%p1740_p5), %s301_s7, 4294967168  ;;  %p1741_p11 = scmp.eq.s32.totalorder %s1413_s25, 0 }
  0xb2   : > { %1319 = dma.done.wait (%p1741_p11), [#allocation6], 512   ;;  %p1742_p9 = pmov %p1741_p11 }
  0xb4   : > { %1321 = vsyncadd (%p1742_p9), [#allocation6], 4294966784  ;;  %p1743_p3 = pmov %p1742_p9 }
  0xb6   : > { %1323 = dma.done.wait (%p1743_p3), [#allocation9], 1024   ;;  %p1744_p7 = pmov %p1743_p3 }
  0xb7   : > { %v1353_v0 = vmov 0.0|0.0   ;;  %vm1354_vm0 = vmmov 0   ;;  %v1355_v1 = vmov 0.0   ;;  %v360_v2 = vld [vmem:[#allocation7] sm:$0xff]  ;;  %v361_v3 = vld [vmem:[#allocation7 + $0x8] sm:$0xff]  ;;  %v362_v4 = vld [vmem:[#allocation7 + $0x10] sm:$0xff] }
  0xb8   : > { %1325 = vsyncadd (%p1744_p7), [#allocation9], 4294966272  ;;  %1009 = vmatprep.subr.bf16.mxu1 %v1353_v0  ;;  %974 = vmatprep.mubr.msk.f32.mxu1 %vm1354_vm0, %v1355_v1  ;;  %v1010_v5 = vpack.c.bf16 %v361_v3, %v360_v2  ;;  %v363_v6 = vld [vmem:[#allocation7 + $0x18] sm:$0xff]  ;;  %v358_v8 = vld [vmem:[%s295_s20] sm:$0xff]  ;;  %vm364_vm1 = vcmask 261120   ;;  %vm514_vm2 = vcmask 64512  }
  0xb9   : > { %1015 = vmatprep.subr.bf16.mxu0 %v1353_v0  ;;  %995 = vmatprep.mubr.msk.f32.mxu0 %vm1354_vm0, %v1355_v1  ;;  %v1013_v7 = vpack.c.bf16 %v363_v6, %v362_v4  ;;  %v359_v9 = vld [vmem:[%s304_s8] sm:$0xff]  ;;  %v604_v20 = vld [vmem:[#allocation10] sm:$0xff]  ;;  %v605_v21 = vld [vmem:[#allocation10 + $0x8] sm:$0xff]  ;;  %p354_p12 = scmp.lt.s32.totalorder %s1413_s25, 1  ;;  %s944_s10 = sshll.u32 %s1413_s25, 7 }
  0xba   : > { %1011 = vmatpush3.bf16.msra.mxu1 %v1010_v5  ;;  %v606_v22 = vld [vmem:[#allocation10 + $0x10] sm:$0xff]  ;;  %v1016_v23 = vpack.c.bf16 %v605_v21, %v604_v20  ;;  %v607_v24 = vld [vmem:[#allocation10 + $0x18] sm:$0xff]  ;;  %v600_v26 = vld [vmem:[#allocation8] sm:$0xff]  ;;  %s347_s3 = scalar_lea.vmem [#allocation11], %s1623_s4  ;;  %s1669_s13 = scalar_lea.hbm %s1719_s5, %s944_s10 }
  0xbb   : > { %1012 = vmatprep.subr.bf16.mxu1 %v1353_v0  ;;  %v1019_v25 = vpack.c.bf16 %v607_v24, %v606_v22  ;;  %v601_v27 = vld [vmem:[#allocation8 + $0x8] sm:$0xff]  ;;  %v602_v29 = vld [vmem:[#allocation8 + $0x10] sm:$0xff]  ;;  %v603_v30 = vld [vmem:[#allocation8 + $0x18] sm:$0xff]  ;;  %s355_s27 = scalar_select %p354_p12, %s1413_s25, 1 }
  0xbc   : > { %1017 = vmatpush3.bf16.msra.mxu0 %v1016_v23  ;;  %v1022_v28 = vpack.c.bf16 %v601_v27, %v600_v26  ;;  %v1025_v31 = vpack.c.bf16 %v603_v30, %v602_v29  ;;  %s771_s12 = sshll.u32 %s347_s3, 4  ;;  %s754_s9 = scalar_lea.sflag [#allocation4], %s1620_s2  ;;  %s1671_s12 = int_to_ptr.vmem [resolvable:$true] %s771_s12 }
  0xbd   : > { %1018 = vmatprep.subr.bf16.mxu0 %v1353_v0  ;;  %s936_s11 = sshll.u32 %s355_s27, 3  ;;  %s1266_s20 = scalar_lea.vmem %s1671_s12, 128 }
  0xbe   : > { %1014 = vmatpush3.bf16.msra.mxu1 %v1013_v7  ;;  %s357_s17 = scalar_lea.vmem %s1720_s6, %s936_s11  ;;  %p1267_p1 = scmp.ne.s32.totalorder %s1671_s12, %s1266_s20 }
  0xbf   : > { %977 = vmatprep.subr.mxu1 %v1355_v1  ;;  %p1745_p2 = scmp.ne.s32.totalorder %s1737_s15, 0  ;;  %s1356_s25 = smov [#allocation11]  }
  0xc0   : > { %1020 = vmatpush3.bf16.msra.mxu0 %v1019_v25  ;;  %s1270_s4 = sshll.u32 %s1356_s25, 4  ;;  %s1271_s4 = int_to_ptr.vmem [resolvable:$false] %s1270_s4 }
  0xc1   : > { %975 = vmatmul.mubr.msk.f32.vlgmr.msra.gmra.mrb[0].mxu1 %vm364_vm1, %v358_v8  ;;  %1021 = vmatprep.subr.bf16.mxu0 %v1353_v0  ;;  %p1268_p4 = pnand %p1267_p1, %p1745_p2  ;;  %s1272_s29 = scalar_lea.vmem %s1271_s4, 256 }
  0xc2   : > { %979 = vmatprep.mubr.msk.f32.mxu1 %vm1354_vm0, %v1355_v1  ;;  %p1273_p8 = scmp.lt.s32.totalorder %s1671_s12, %s1271_s4  ;;  %p1274_p6 = scmp.lt.s32.totalorder %s1272_s29, %s1266_s20 }
  0xc3   : > { %996 = vmatmul.mubr.msk.f32.vlgmr.msra.gmra.mrb[0].mxu0 %vm364_vm1, %v358_v8  ;;  %p1269_p0 = pneg %p1268_p4 }
  0xc4   : > { %1023 = vmatpush3.bf16.msra.mxu0 %v1022_v28  ;;  %1006 = vmatprep.mubr.msk.f32.mxu0 %vm1354_vm0, %v1355_v1  ;;  %p1275_p10 = por %p1274_p6, %p1273_p8 }
  0xc5   : > { %1024 = vmatprep.subr.bf16.mxu0 %v1353_v0 }
  0xc6   : > { %p1276_p13 = pnand %p1275_p10, %p1269_p0 }
  0xc7   : > { %978 = vmatpush3.xpose.msk.msra.mxu1 %vm364_vm1, %v359_v9 }
  0xc8   : > { %982 = vmatprep.subr.mxu1 %v1355_v1  ;;  %1026 = vmatpush3.bf16.msra.mxu0 %v1025_v31 }
 0x194   : > { %v434_v10 = vpop.f32.mrb[0].mxu1 }
 0x195   : > { %v976_v11 = vpop.f32.mrb[1].mxu1  ;;  %980 = vmatmul.mubr.msk.f32.vlgmr.msra.gmra.mrb[2].mxu1 %vm364_vm1, %v434_v10 }
 0x196   : > { %983 = vmatpush3.msra.mxu1 %v359_v9  ;;  %984 = vmatprep.mubr.msk.f32.mxu1 %vm1354_vm0, %v1355_v1 }
 0x268   : > { %v510_v12 = vpop.f32.mrb[2].mxu1 }
 0x269   : > { %v981_v13 = vpop.f32.mrb[3].mxu1  ;;  %v515_v14 = vsel %vm514_vm2, %v510_v12, -inf }
 0x26a   : > { %516 = vmax.xlane.f32.xlu0 %v515_v14 }
 0x2f7   : > { %v517_v15 = vpop.xlane.xlu0 %516 }
 0x2f8   : > { %v518_v16 = vsub.f32 %v510_v12, %v517_v15 }
 0x2fa   : > { %v519_v17 = vmul.f32 1.442695, %v518_v16 }
 0x2fc   : > { %1116 = vpow2.f32 %v519_v17 }
 0x306   : > { %v1117_v18 = vpop.eup %1116 }
 0x307   : > { %v521_v19 = vsel %vm514_vm2, %v1117_v18, 0.0 }
 0x308   : > { %522 = vadd.xlane.f32.xlu0 %v521_v19 }
 0x395   : > { %v523_v32 = vpop.xlane.xlu0 %522 }
 0x396   : > { %1118 = vrcp.f32 %v523_v32 }
 0x3a0   : > { %v1119_v33 = vpop.eup %1118 }
 0x3a1   : > { %v525_v34 = vmul.f32 %v1119_v33, %v1117_v18 }
 0x3a3   : > { %526 = vst.msk [vmem:[%s357_s17] sm:$0xff] %vm514_vm2, %v525_v34  ;;  %985 = vmatmul.mubr.msk.f32.vlgmr.msra.gmra.mrb[4].mxu1 %vm514_vm2, %v525_v34 }
 0x476   : > { %v596_v35 = vpop.f32.mrb[4].mxu1 }
 0x477   : > { %v986_v36 = vpop.f32.mrb[5].mxu1  ;;  %1007 = vmatmul.mubr.msk.f32.vlgmr.msra.gmra.mrb[0].mxu0 %vm364_vm1, %v596_v35 }
 0x54a   : > { %v747_v37 = vpop.f32.mrb[0].mxu0 }
 0x54b   : > { %1120 = vtanh.f32 %v747_v37  ;;  %v1008_v38 = vpop.f32.mrb[1].mxu0 }
 0x555   : > { %v1121_v39 = vpop.eup %1120 }
 0x556   : > { %752 = vst.msk [vmem:[%s347_s3] sm:$0xff] %vm364_vm1, %v1121_v39 }
 0x557   : > { %1279 = shalt.err (!%p1276_p13)
}
 0x558   : > { %s1280_s2 = scalar_lea.hbm %s1669_s13, 128  ;;  %s1284_s27 = scalar_lea.hbm %s1719_s5, 256 }
 0x559   : > { %p1281_p5 = scmp.ne.s32.totalorder %s1669_s13, %s1280_s2  ;;  %p1285_p3 = scmp.lt.u32.totalorder %s1669_s13, %s1719_s5 }
 0x55a   : > { %p1286_p7 = scmp.lt.u32.totalorder %s1284_s27, %s1280_s2  ;;  %p1288_p1 = scmp.lt.u32.totalorder %s1280_s2, %s1669_s13 }
 0x55b   : > { %p1282_p11 = pnand %p1281_p5, %p1745_p2 }
 0x55c   : > { %p1287_p12 = por %p1286_p7, %p1285_p3 }
 0x55d   : > { %p1283_p9 = pneg %p1282_p11 }
 0x55e   : > { %p1289_p4 = por %p1288_p1, %p1287_p12 }
 0x560   : > { %p1290_p0 = pnand %p1289_p4, %p1283_p9 }
 0x562   : > { %1293 = shalt.err (!%p1290_p0)
}
 0x563   : > { %1045 = dma.vmem_to_hbm [thread:$0]  (%p1745_p2), %s1671_s12, 128, %s1669_s13, %s754_s9  }
 0x564 PF: > { %s786_s16 = sand.u32 1, %s1332_s21   ;;  %p1746_p8 = scmp.ne.s32.totalorder %s1729_s28, 0 }
 0x565   : > { %p1747_p6 = scmp.ge.s32.totalorder %s1344_s24, 2  ;;  %s787_s17 = scalar_lea.sflag [#allocation4], %s786_s16 }
 0x567   : > { %p1065_p10 = pnand %p1747_p6, %p1746_p8 }
 0x569   : > { %1327 = dma.done.wait (!%p1065_p10), %s787_s17, 128  }
 0x56a   : > { %1329 = vsyncadd (!%p1065_p10), %s787_s17, 4294967168  ;;  %p24_p13 = scmp.ge.s32.totalorder %s1532_s18, 4   ;;  %s1748_s21 = smov %s1336_s22 }
 0x56b   : > { %s1749_s22 = smov %s1340_s23  ;;  %s1750_s23 = smov %s1542_s14 }
 0x56c   : > { %s1751_s24 = smov %s1532_s18  ;;  %26 = sbr.rel (!%p24_p13) target bundleno = 12 (0xc), region = 122 }
 0x573   :  { %799 = vsyncpa [#allocation3], 1 }
 0x574   :  { %801 = vsyncpa [#allocation3 + $0x1], 1 }
 0x575   :  { %802 = vsyncpa [#allocation6], 1 }
 0x576   :  { %804 = vsyncpa [#allocation6 + $0x1], 1 }
 0x577   :  { %805 = vsyncpa [#allocation9], 1 }
 0x578   :  { %806 = vsyncpa [#allocation4], 1 }
 0x579   :  { %808 = vsyncpa [#allocation4 + $0x1], 1 }

</bundles_post_ra>
